<compile_context>
chip_gen: v6e
topology: v6e:2x2x1
jax: 0.10.0
libtpu: 0.0.40
codegen_flags: <defaults>
</compile_context>

<pallas_src>
import functools

import jax
import jax.numpy as jnp
from jax.experimental import pallas as pl
from jax.experimental.pallas import tpu as pltpu


def _make_divisible(v, divisor, min_value=None):
    if min_value is None:
        min_value = divisor
    new_v = max(min_value, int(v + divisor / 2) // divisor * divisor)
    if new_v < 0.9 * v:
        new_v += divisor
    return new_v


def _vmem_capacity_bytes():
    """Physical VMEM capacity (bytes); conservative 64 MiB fallback (v7x)."""
    try:
        return int(pltpu.get_tpu_info().vmem_capacity_bytes)
    except Exception:
        return 64 << 20


def _se_kernel(x_ref, w1_ref, w2_ref, o_ref, *, inv_hw, bt):
    # x_ref / o_ref: (bt, C, HW) block; w1_ref: (mid, C); w2_ref: (C, mid).
    # Weights are tiny; load once per grid step and compute the gate in f32.
    w1 = w1_ref[...].astype(jnp.float32)                              # (mid, C)
    w2 = w2_ref[...].astype(jnp.float32)                              # (C, mid)

    # Static unroll over the batch tile (bt is small, <= 8).  Each row keeps
    # the channel axis on sublanes and HW on lanes, so the (C,1) gate
    # broadcasts over lanes with no cross-lane relayout.
    for b in range(bt):
        # Global average pool over spatial; accumulate in f32 (upcast fused
        # into the reduce), divide by the TRUE H*W.
        pooled = jnp.sum(x_ref[b], axis=-1, keepdims=True,
                         dtype=jnp.float32) * inv_hw                  # (C, 1)

        # 1x1 conv on a 1x1 map == mat-vec.  (C -> mid) + ReLU, then (mid -> C).
        h = jnp.dot(w1, pooled, preferred_element_type=jnp.float32)   # (mid, 1)
        h = jnp.maximum(h, 0.0)
        v = jnp.dot(w2, h, preferred_element_type=jnp.float32)        # (C, 1)

        # HardSigmoid: relu6(v + 3) * 1/6
        gate = jnp.clip(v + 3.0, 0.0, 6.0) * 0.16666666666666666      # (C, 1)

        # Re-read x_ref for the scale (don't reuse the pooled load's value), so
        # the whole row tile is not kept live across the gate math.
        o_ref[b] = x_ref[b] * gate.astype(o_ref.dtype)


@jax.jit
def se_module_conv(x_nchw, w1, w2):
    """x_nchw: (N, C, H, W); w1: (mid, C) = fc[0].weight[:, :, 0, 0];
    w2: (C, mid) = fc[2].weight[:, :, 0, 0].  Output dtype == input dtype."""
    N, C, H, W = x_nchw.shape
    HW = H * W
    mid = w1.shape[0]

    # --- batch tile size: ~1-2 MiB blocks, grid >= 2 steps, short unroll ---
    per_batch_bytes = C * HW * x_nchw.dtype.itemsize
    target_bytes = 2 << 20
    bt = max(1, min(N, target_bytes // max(per_batch_bytes, 1)))
    bt = min(bt, 8)                       # cap static unroll length
    if N >= 2:
        bt = min(bt, -(-N // 2))          # at least 2 grid steps (v7x: 2 TCs)

    # --- generation-aware VMEM budget (double-buffered in/out + weights) ---
    cap = _vmem_capacity_bytes()
    hard_cap = max(16 << 20, (cap * 7) // 8)   # ~56 MiB on v7x, ~112 on v5e/v6e
    w_bytes = (w1.size * w1.dtype.itemsize + w2.size * w2.dtype.itemsize)

    def _needed(bt_):
        return 4 * bt_ * per_batch_bytes + 2 * w_bytes + (2 << 20)

    while bt > 1 and _needed(bt) > hard_cap:
        bt -= 1
    # NOTE: if even bt=1 exceeds the cap (enormous C*HW), a spatial split of HW
    # would be needed; such shapes do not occur for SE blocks in practice.
    vmem_limit = int(min(max(_needed(bt), 16 << 20), hard_cap))

    grid = (pl.cdiv(N, bt),)
    kernel = functools.partial(_se_kernel, inv_hw=1.0 / HW, bt=bt)

    out = pl.pallas_call(
        kernel,
        out_shape=jax.ShapeDtypeStruct((N, C, HW), x_nchw.dtype),
        grid_spec=pltpu.PrefetchScalarGridSpec(
            num_scalar_prefetch=0,
            grid=grid,
            in_specs=[
                # Full C / HW extents: legal full-dim blocks, no padding pass.
                pl.BlockSpec((bt, C, HW), lambda n: (n, 0, 0)),
                pl.BlockSpec((mid, C), lambda n: (0, 0)),
                pl.BlockSpec((C, mid), lambda n: (0, 0)),
            ],
            out_specs=pl.BlockSpec((bt, C, HW), lambda n: (n, 0, 0)),
        ),
        compiler_params=pltpu.CompilerParams(
            dimension_semantics=("parallel",),
            vmem_limit_bytes=vmem_limit,
        ),
    )(x_nchw.reshape(N, C, HW), w1, w2)

    return out.reshape(N, C, H, W)


def se_module_conv_ref(x_nchw, w1, w2):
    """Pure-JAX reference matching the PyTorch forward (f32 math)."""
    x32 = x_nchw.astype(jnp.float32)
    pooled = jnp.mean(x32, axis=(2, 3))                              # (N, C)
    h = jnp.maximum(pooled @ w1.astype(jnp.float32).T, 0.0)          # (N, mid)
    v = h @ w2.astype(jnp.float32).T                                 # (N, C)
    gate = jnp.clip(v + 3.0, 0.0, 6.0) * 0.16666666666666666         # (N, C)
    return x32 * gate[:, :, None, None]


if __name__ == "__main__":
    key = jax.random.PRNGKey(0)

    # --- case 1: canonical small test shape (lane-dense HW) -----------------
    N, C, H, W = 2, 4, 16, 16
    reduction = 4
    mid = _make_divisible(C // reduction, 8)   # = 8 for C=4

    kx, k1, k2, k3, k4, k5 = jax.random.split(key, 6)
    x = jax.random.normal(kx, (N, C, H, W), dtype=jnp.float32)
    w1 = jax.random.normal(k1, (mid, C), dtype=jnp.float32) * 0.1  # fc[0].weight[:, :, 0, 0]
    w2 = jax.random.normal(k2, (C, mid), dtype=jnp.float32) * 0.1  # fc[2].weight[:, :, 0, 0]

    ref = se_module_conv_ref(x, w1, w2)
    out = jax.block_until_ready(se_module_conv(x, w1, w2))
    assert out.shape == (N, C, H, W)
    assert out.dtype == x.dtype
    assert jnp.allclose(out, ref, atol=1e-5, rtol=1e-5), "f32 mismatch vs reference"

    # bf16 input path (x already bf16 in HBM -> bf16 carry is a genuine win).
    x_bf = x.astype(jnp.bfloat16)
    w1_bf = w1.astype(jnp.bfloat16)
    w2_bf = w2.astype(jnp.bfloat16)
    out_bf = jax.block_until_ready(se_module_conv(x_bf, w1_bf, w2_bf))
    assert out_bf.shape == (N, C, H, W)
    assert out_bf.dtype == jnp.bfloat16
    assert jnp.allclose(out_bf.astype(jnp.float32), ref, atol=5e-2, rtol=5e-2), \
        "bf16 mismatch vs reference"

    # --- case 2: non-aligned dims (C=12 sublanes, 7x7 -> 49 lanes, masked st) -
    N2, C2, H2, W2 = 2, 12, 7, 7
    mid2 = _make_divisible(C2 // reduction, 8)   # = 8
    x2 = jax.random.normal(k3, (N2, C2, H2, W2), dtype=jnp.float32)
    w1b = jax.random.normal(k4, (mid2, C2), dtype=jnp.float32) * 0.1
    w2b = jax.random.normal(k5, (C2, mid2), dtype=jnp.float32) * 0.1

    out2 = jax.block_until_ready(se_module_conv(x2, w1b, w2b))
    ref2 = se_module_conv_ref(x2, w1b, w2b)
    assert out2.shape == (N2, C2, H2, W2)
    assert jnp.allclose(out2, ref2, atol=1e-5, rtol=1e-5), "non-aligned-case mismatch vs reference"

    print("KERNEL_OK")
</pallas_src>

<mosaic_0001>
module attributes {stable_mosaic.version = 11 : i64} {
  func.func @_se_kernel(%arg0: i32, %arg1: memref<1x4x256xf32, #tpu.memory_space<vmem>>, %arg2: memref<8x4xf32, #tpu.memory_space<vmem>>, %arg3: memref<4x8xf32, #tpu.memory_space<vmem>>, %arg4: memref<1x4x256xf32, #tpu.memory_space<vmem>>) attributes {dimension_semantics = [#tpu.dimension_semantics<parallel>], iteration_bounds = array<i64: 2>, scalar_prefetch = 0 : i64, scratch_operands = 0 : i64, tpu.core_type = #tpu.core_type<tc>, window_params = [{transform_indices = @transform_0, window_bounds = array<i64: 1, 4, 256>}, {pipeline_mode = #tpu.pipeline_mode<synchronous>, transform_indices = @transform_1, window_bounds = array<i64: 8, 4>}, {pipeline_mode = #tpu.pipeline_mode<synchronous>, transform_indices = @transform_2, window_bounds = array<i64: 4, 8>}, {transform_indices = @transform_3, window_bounds = array<i64: 1, 4, 256>}]} {
    %c0 = arith.constant 0 : index
    %c0_0 = arith.constant 0 : index
    %0 = vector.load %arg2[%c0, %c0_0] : memref<8x4xf32, #tpu.memory_space<vmem>>, vector<8x4xf32>
    %c0_1 = arith.constant 0 : index
    %c0_2 = arith.constant 0 : index
    %1 = vector.load %arg3[%c0_1, %c0_2] : memref<4x8xf32, #tpu.memory_space<vmem>>, vector<4x8xf32>
    %c0_3 = arith.constant 0 : index
    %c0_4 = arith.constant 0 : index
    %c0_5 = arith.constant 0 : index
    %2 = vector.load %arg1[%c0_3, %c0_4, %c0_5] : memref<1x4x256xf32, #tpu.memory_space<vmem>>, vector<1x4x256xf32>
    %3 = vector.shape_cast %2 : vector<1x4x256xf32> to vector<4x256xf32>
    %cst = arith.constant dense<0.000000e+00> : vector<4xf32>
    %4 = vector.multi_reduction <add>, %3, %cst [1] : vector<4x256xf32> to vector<4xf32>
    %5 = vector.shape_cast %4 : vector<4xf32> to vector<4x1xf32>
    %cst_6 = arith.constant 3.906250e-03 : f32
    %6 = vector.broadcast %cst_6 : f32 to vector<4x1xf32>
    %7 = arith.mulf %5, %6 : vector<4x1xf32>
    %cst_7 = arith.constant dense<0.000000e+00> : vector<8x1xf32>
    %8 = tpu.matmul %0, %7, %cst_7 {dimension_numbers = #tpu.dot_dimension_numbers<[1], [0], [0], [1], [0, 0, 1, 1], [], []>} : vector<8x4xf32>, vector<4x1xf32>, vector<8x1xf32> -> vector<8x1xf32>
    %cst_8 = arith.constant 0.000000e+00 : f32
    %9 = vector.broadcast %cst_8 : f32 to vector<8x1xf32>
    %10 = arith.maximumf %8, %9 : vector<8x1xf32>
    %cst_9 = arith.constant dense<0.000000e+00> : vector<4x1xf32>
    %11 = tpu.matmul %1, %10, %cst_9 {dimension_numbers = #tpu.dot_dimension_numbers<[1], [0], [0], [1], [0, 0, 1, 1], [], []>} : vector<4x8xf32>, vector<8x1xf32>, vector<4x1xf32> -> vector<4x1xf32>
    %cst_10 = arith.constant 3.000000e+00 : f32
    %12 = vector.broadcast %cst_10 : f32 to vector<4x1xf32>
    %13 = arith.addf %11, %12 : vector<4x1xf32>
    %cst_11 = arith.constant 0.000000e+00 : f32
    %cst_12 = arith.constant 6.000000e+00 : f32
    %14 = vector.broadcast %cst_11 : f32 to vector<4x1xf32>
    %15 = arith.maximumf %14, %13 : vector<4x1xf32>
    %16 = vector.broadcast %cst_12 : f32 to vector<4x1xf32>
    %17 = arith.minimumf %16, %15 : vector<4x1xf32>
    %cst_13 = arith.constant 0.166666672 : f32
    %18 = vector.broadcast %cst_13 : f32 to vector<4x1xf32>
    %19 = arith.mulf %17, %18 : vector<4x1xf32>
    %c0_14 = arith.constant 0 : index
    %c0_15 = arith.constant 0 : index
    %c0_16 = arith.constant 0 : index
    %20 = vector.load %arg1[%c0_14, %c0_15, %c0_16] : memref<1x4x256xf32, #tpu.memory_space<vmem>>, vector<1x4x256xf32>
    %21 = vector.shape_cast %20 : vector<1x4x256xf32> to vector<4x256xf32>
    %22 = vector.broadcast %19 : vector<4x1xf32> to vector<4x256xf32>
    %23 = arith.mulf %21, %22 : vector<4x256xf32>
    %c0_17 = arith.constant 0 : index
    %c0_18 = arith.constant 0 : index
    %c0_19 = arith.constant 0 : index
    %24 = vector.load %arg4[%c0_17, %c0_18, %c0_19] : memref<1x4x256xf32, #tpu.memory_space<vmem>>, vector<1x4x256xf32>
    %25 = vector.shape_cast %24 : vector<1x4x256xf32> to vector<4x256xf32>
    %26 = vector.shape_cast %23 : vector<4x256xf32> to vector<1x4x256xf32>
    tpu.vector_store %arg4[%c0_17, %c0_18, %c0_19], %26 {strides = array<i32>} : memref<1x4x256xf32, #tpu.memory_space<vmem>>, vector<1x4x256xf32>,
    return
  }
  func.func @transform_0(%arg0: i32) -> (i32, i32, i32) {
    %c0_i32 = arith.constant 0 : i32
    %c0_i32_0 = arith.constant 0 : i32
    %c0_i32_1 = arith.constant 0 : i32
    return %arg0, %c0_i32, %c0_i32_0 : i32, i32, i32
  }
  func.func @transform_1(%arg0: i32) -> (i32, i32) {
    %c0_i32 = arith.constant 0 : i32
    %c0_i32_0 = arith.constant 0 : i32
    %c0_i32_1 = arith.constant 0 : i32
    return %c0_i32, %c0_i32_0 : i32, i32
  }
  func.func @transform_2(%arg0: i32) -> (i32, i32) {
    %c0_i32 = arith.constant 0 : i32
    %c0_i32_0 = arith.constant 0 : i32
    %c0_i32_1 = arith.constant 0 : i32
    return %c0_i32, %c0_i32_0 : i32, i32
  }
  func.func @transform_3(%arg0: i32) -> (i32, i32, i32) {
    %c0_i32 = arith.constant 0 : i32
    %c0_i32_0 = arith.constant 0 : i32
    %c0_i32_1 = arith.constant 0 : i32
    return %arg0, %c0_i32, %c0_i32_0 : i32, i32, i32
  }
}

</mosaic_0001>

<bundles_post_ra>
// kernel: se_module_conv.1
= control target key start
LH: loop header
LB: loop body
LE: loop exit
PB: predicated region body
PF: predicated region fallthrough
CT: control target
= control target key end

     0   :  { %s484_s12 = smov 0   ;;  %s517_s0 = inlined_call_operand.vmem [shape: f32[2,4,256], index: 0, kind: input, shape index: {}]   ;;  %s518_s1 = inlined_call_operand.vmem [shape: f32[8,4], index: 1, kind: input, shape index: {}]   ;;  %s519_s2 = inlined_call_operand.vmem [shape: f32[4,8], index: 2, kind: input, shape index: {}]   ;;  %s520_s3 = inlined_call_operand.vmem [shape: f32[2,4,256], index: 3, kind: output, shape index: {}]  }
   0x1 LB: > { %s408_s13 = sadd.s32 4294967295, %s458_s12   ;;  %p412_p0 = scmp.ge.s32.totalorder %s458_s12, 1  ;;  %s458_s12 = sphi %s484_s12, %s13_s12  }
   0x2   : > { %p137_p1 = scmp.lt.s32.totalorder %s458_s12, 3 }
   0x4   : > { %p138_p2 = pnand %p412_p0, %p137_p1 }
   0x5   : > { %p161_p3 = scmp.lt.s32.totalorder (!%p138_p2), %s408_s13, 1 }
   0x6   : > { %141 = sbr.rel (%p138_p2) target bundleno = 687 (0x2af), region = 32 }
   0xb   : > { %s522_s13 = smov (!%p161_p3, %s408_s13), 1  ;;  %vm177_vm0 = vcmask 1043456   ;;  %v460_v5 = vmov 0.0   ;;  %vm461_vm1 = vmmov 0   ;;  %v171_v8 = vld [vmem:[%s518_s1] sm:$0xff]  ;;  %vm184_vm2 = vcmask 31744  }
   0xc   : > { %s422_s14 = sshll.u32 %s522_s13, 3  ;;  %428 = vmatprep.subr.mxu0 %v460_v5  ;;  %433 = vmatprep.subr.mxu1 %v460_v5  ;;  %v172_v11 = vld [vmem:[%s519_s2] sm:$0xf]  ;;  %vm262_vm3 = vcmask 64512   ;;  %v462_v13 = vmov 0   ;;  %v346_v22 = vlaneseq }
   0xd   : > { %s165_s17 = scalar_lea.vmem %s517_s0, %s422_s14  ;;  %430 = vmatprep.mubr.msk.f32.mxu0 %vm461_vm1, %v460_v5  ;;  %435 = vmatprep.mubr.msk.f32.mxu1 %vm461_vm1, %v460_v5  ;;  %v463_v20 = vmov 839922192   ;;  %s170_s24 = scalar_lea.vmem %s520_s3, %s422_s14 }
   0xe   : > { %v173_v0 = vld [vmem:[%s165_s17] sm:$0xff]  ;;  %450 = vset.pattern.permute.xlu0 %v462_v13  ;;  %v344_v21 = vunpack.c.l.s4 %v463_v20  ;;  %v347_v24 = vshrl.u32 %v346_v22, 7 }
   0xf   : > { %v175_v1 = vcombine.high %v173_v0, %v173_v0  ;;  %v178_v2 = vsel %vm177_vm0, %v173_v0, 0.0 }
  0x10   : > { %v345_v23 = vunpack.c.0.s8 %v344_v21 }
  0x11   : > { %v179_v3 = vsel %vm177_vm0, %v175_v1, 0.0 }
  0x12   : > { %v180_v4 = vadd.f32 %v179_v3, %v178_v2  ;;  %v348_v25 = vsub.s32 %v345_v23, %v347_v24 }
  0x14   : > { %181 = vadd.xlane.f32.xlu0 %v180_v4 }
  0x9d   : > { %v182_v6 = vpop.xlane.xlu0 %181 }
  0x9e   : > { %v183_v7 = vmul.f32 0.00390625, %v182_v6 }
  0xa0   : > { %429 = vmatpush3.msk.msra.mxu0 %vm177_vm0, %v183_v7 }
  0xa1   : > { %431 = vmatmul.mubr.msk.f32.vlgmr.msra.gmra.mxu0 %vm184_vm2, %v171_v8 }
 0x161   : > { %v257_v9 = vpop.f32.mrf.mxu0 }
 0x162   : > { %v261_v10 = vmax.f32 %v257_v9, 0.0 }
 0x163   : > { %v432_v12 = vpop.f32.mrf.mxu0 }
 0x164   : > { %434 = vmatpush3.msra.mxu1 %v261_v10 }
 0x165   : > { %436 = vmatmul.mubr.msk.f32.vlgmr.msra.gmra.mxu1 %vm262_vm3, %v172_v11 }
 0x225   : > { %v332_v14 = vpop.f32.mrf.mxu1 }
 0x226   : > { %v333_v15 = vadd.f32 3.0, %v332_v14 }
 0x227   : > { %v437_v16 = vpop.f32.mrf.mxu1 }
 0x228   : > { %v336_v17 = vmax.f32 %v333_v15, 0.0 }
 0x22a   : > { %v337_v18 = vmin.f32 %v336_v17, 6.0 }
 0x22c   : > { %v338_v19 = vmul.f32 0.16666667, %v337_v18 }
 0x22e   : > { %341 = vperm.xlu0 %450, %v338_v19  }
 0x2a9   : > { %v342_v26 = vpop.permute.xlu0 %341 }
 0x2aa   : > { %v349_v27 = vrot.slane %v342_v26, %v348_v25 }
 0x2ac   : > { %v351_v28 = vmul.f32 %v349_v27, %v173_v0 }
 0x2ae   : > { %352 = vst [vmem:[%s170_s24] sm:$0xff] %v351_v28 }
 0x2af PF: > { %s13_s12 = sadd.s32 1, %s458_s12  }
 0x2b0   : > { %p10_p4 = scmp.ge.s32.totalorder %s13_s12, 4  }
 0x2b2   :  { %12 = sbr.rel (!%p10_p4) target bundleno = 1 (0x1), region = 62 }

</bundles_post_ra>
